<compile_context>
chip_gen: v7x
topology: tpu7x:2x2x1
jax: 0.10.0
libtpu: 0.0.40
codegen_flags: <defaults>
</compile_context>

<pallas_src>
import jax
import jax.numpy as jnp
from jax import lax
from jax.experimental import pallas as pl
from jax.experimental.pallas import tpu as pltpu

# ---------------- dimensions ----------------
SIZE = 256        # ResidualBlock(size): feature width (MXU/lane aligned)
BATCH = 512       # rows per call
BT = 256          # batch tile -> grid of 2 "parallel" steps (feeds both v7x TCs)


# ---------------- Pallas kernel ----------------
def resblock_kernel(x_ref, w_ref, b_ref, scale_ref, shift_ref, o_ref):
    x = x_ref[...]                                            # (BT, D) f32

    # Linear(size, size): bf16 operands on the MXU, f32 accumulation.
    z = jnp.dot(x.astype(jnp.bfloat16), w_ref[...],
                preferred_element_type=jnp.float32)
    z = z + b_ref[...]                                        # bias (1, D) broadcast

    # BatchNorm1d (eval mode) folded to per-feature scale/shift.
    z = z * scale_ref[...] + shift_ref[...]

    # Residual add + ReLU; one lane-dense full-block store.
    o_ref[...] = jnp.maximum(z + x, 0.0)


# ---------------- wrapper ----------------
def residual_block_forward(x, w_t, b, gamma, beta, running_mean, running_var,
                           eps=1e-5):
    """x: (B, D) float32.  w_t: (D, D) = Linear.weight.T so y = x @ w_t + b."""
    B, D = x.shape
    assert B % BT == 0 and D % 128 == 0

    # Fold BN running stats into scale/shift (exact for eval-mode BN).
    inv_std = lax.rsqrt(running_var + eps)
    scale = (gamma * inv_std).reshape(1, D).astype(jnp.float32)
    shift = (beta - running_mean * gamma * inv_std).reshape(1, D).astype(jnp.float32)

    w_bf16 = w_t.astype(jnp.bfloat16)          # halve weight VMEM/DMA, bf16 MXU path
    b2 = b.reshape(1, D).astype(jnp.float32)

    grid = (pl.cdiv(B, BT),)
    cost = pl.CostEstimate(
        flops=2 * B * D * D + 6 * B * D,
        transcendentals=0,
        bytes_accessed=2 * B * D * 4 + D * D * 2 + 3 * D * 4,
    )

    return pl.pallas_call(
        resblock_kernel,
        out_shape=jax.ShapeDtypeStruct((B, D), jnp.float32),
        grid_spec=pltpu.PrefetchScalarGridSpec(
            num_scalar_prefetch=0,
            grid=grid,
            in_specs=[
                pl.BlockSpec((BT, D), lambda i: (i, 0)),   # x tile
                pl.BlockSpec((D, D), lambda i: (0, 0)),    # weights (grid-invariant)
                pl.BlockSpec((1, D), lambda i: (0, 0)),    # bias
                pl.BlockSpec((1, D), lambda i: (0, 0)),    # BN scale
                pl.BlockSpec((1, D), lambda i: (0, 0)),    # BN shift
            ],
            out_specs=pl.BlockSpec((BT, D), lambda i: (i, 0)),
        ),
        compiler_params=pltpu.CompilerParams(
            dimension_semantics=("parallel",)),
        cost_estimate=cost,
    )(x, w_bf16, b2, scale, shift)


# ---------------- pure-JAX reference (same math, for validation) ----------------
def reference_forward(x, w_t, b, gamma, beta, running_mean, running_var, eps=1e-5):
    z = jnp.dot(x.astype(jnp.bfloat16), w_t.astype(jnp.bfloat16),
                preferred_element_type=jnp.float32) + b[None, :]
    z = (z - running_mean[None, :]) * lax.rsqrt(running_var[None, :] + eps)
    z = z * gamma[None, :] + beta[None, :]
    return jnp.maximum(z + x, 0.0)


if __name__ == "__main__":
    key = jax.random.PRNGKey(0)
    keys = jax.random.split(key, 8)

    D, B = SIZE, BATCH
    x = jax.random.normal(keys[0], (B, D), jnp.float32)

    # Linear(size, size): store the transposed weight so y = x @ w_t + b.
    w_t = jax.random.uniform(keys[1], (D, D), jnp.float32, -1.0, 1.0) / jnp.sqrt(D)
    b = jax.random.uniform(keys[2], (D,), jnp.float32, -1.0, 1.0) / jnp.sqrt(D)

    # BatchNorm1d parameters + running statistics (eval mode).
    gamma = jax.random.uniform(keys[3], (D,), jnp.float32, 0.5, 1.5)
    beta = jax.random.normal(keys[4], (D,), jnp.float32) * 0.1
    running_mean = jax.random.normal(keys[5], (D,), jnp.float32) * 0.1
    running_var = jax.random.uniform(keys[6], (D,), jnp.float32, 0.5, 1.5)

    out = residual_block_forward(x, w_t, b, gamma, beta, running_mean, running_var)
    out = jax.block_until_ready(out)

    ref = reference_forward(x, w_t, b, gamma, beta, running_mean, running_var)
    assert out.shape == (B, D)
    assert jnp.allclose(out, ref, atol=1e-3, rtol=1e-3), (
        f"max abs diff {jnp.max(jnp.abs(out - ref))}")
    print("KERNEL_OK")
</pallas_src>

<mosaic_0001>
module attributes {stable_mosaic.version = 11 : i64} {
  func.func @resblock_kernel(%arg0: i32, %arg1: memref<256x256xf32, #tpu.memory_space<vmem>>, %arg2: memref<256x256xbf16, #tpu.memory_space<vmem>>, %arg3: memref<1x256xf32, #tpu.memory_space<vmem>>, %arg4: memref<1x256xf32, #tpu.memory_space<vmem>>, %arg5: memref<1x256xf32, #tpu.memory_space<vmem>>, %arg6: memref<256x256xf32, #tpu.memory_space<vmem>>) attributes {dimension_semantics = [#tpu.dimension_semantics<parallel>], iteration_bounds = array<i64: 2>, scalar_prefetch = 0 : i64, scratch_operands = 0 : i64, tpu.core_type = #tpu.core_type<tc>, window_params = [{transform_indices = @transform_0, window_bounds = array<i64: 256, 256>}, {pipeline_mode = #tpu.pipeline_mode<synchronous>, transform_indices = @transform_1, window_bounds = array<i64: 256, 256>}, {pipeline_mode = #tpu.pipeline_mode<synchronous>, transform_indices = @transform_2, window_bounds = array<i64: 1, 256>}, {pipeline_mode = #tpu.pipeline_mode<synchronous>, transform_indices = @transform_3, window_bounds = array<i64: 1, 256>}, {pipeline_mode = #tpu.pipeline_mode<synchronous>, transform_indices = @transform_4, window_bounds = array<i64: 1, 256>}, {transform_indices = @transform_5, window_bounds = array<i64: 256, 256>}]} {
    %c0 = arith.constant 0 : index
    %c0_0 = arith.constant 0 : index
    %0 = vector.load %arg1[%c0, %c0_0] : memref<256x256xf32, #tpu.memory_space<vmem>>, vector<256x256xf32>
    %1 = arith.truncf %0 : vector<256x256xf32> to vector<256x256xbf16>
    %c0_1 = arith.constant 0 : index
    %c0_2 = arith.constant 0 : index
    %2 = vector.load %arg2[%c0_1, %c0_2] : memref<256x256xbf16, #tpu.memory_space<vmem>>, vector<256x256xbf16>
    %cst = arith.constant dense<0.000000e+00> : vector<256x256xf32>
    %3 = tpu.matmul %1, %2, %cst {dimension_numbers = #tpu.dot_dimension_numbers<[1], [0], [0], [1], [0, 0, 1, 1], [], []>} : vector<256x256xbf16>, vector<256x256xbf16>, vector<256x256xf32> -> vector<256x256xf32>
    %c0_3 = arith.constant 0 : index
    %c0_4 = arith.constant 0 : index
    %4 = vector.load %arg3[%c0_3, %c0_4] : memref<1x256xf32, #tpu.memory_space<vmem>>, vector<1x256xf32>
    %5 = vector.broadcast %4 : vector<1x256xf32> to vector<256x256xf32>
    %6 = arith.addf %3, %5 : vector<256x256xf32>
    %c0_5 = arith.constant 0 : index
    %c0_6 = arith.constant 0 : index
    %7 = vector.load %arg4[%c0_5, %c0_6] : memref<1x256xf32, #tpu.memory_space<vmem>>, vector<1x256xf32>
    %8 = vector.broadcast %7 : vector<1x256xf32> to vector<256x256xf32>
    %9 = arith.mulf %6, %8 : vector<256x256xf32>
    %c0_7 = arith.constant 0 : index
    %c0_8 = arith.constant 0 : index
    %10 = vector.load %arg5[%c0_7, %c0_8] : memref<1x256xf32, #tpu.memory_space<vmem>>, vector<1x256xf32>
    %11 = vector.broadcast %10 : vector<1x256xf32> to vector<256x256xf32>
    %12 = arith.addf %9, %11 : vector<256x256xf32>
    %13 = arith.addf %12, %0 : vector<256x256xf32>
    %cst_9 = arith.constant 0.000000e+00 : f32
    %14 = vector.broadcast %cst_9 : f32 to vector<256x256xf32>
    %15 = arith.maximumf %13, %14 : vector<256x256xf32>
    %c0_10 = arith.constant 0 : index
    %c0_11 = arith.constant 0 : index
    %16 = vector.load %arg6[%c0_10, %c0_11] : memref<256x256xf32, #tpu.memory_space<vmem>>, vector<256x256xf32>
    tpu.vector_store %arg6[%c0_10, %c0_11], %15 {strides = array<i32>} : memref<256x256xf32, #tpu.memory_space<vmem>>, vector<256x256xf32>,
    return
  }
  func.func @transform_0(%arg0: i32) -> (i32, i32) {
    %c0_i32 = arith.constant 0 : i32
    %c0_i32_0 = arith.constant 0 : i32
    return %arg0, %c0_i32 : i32, i32
  }
  func.func @transform_1(%arg0: i32) -> (i32, i32) {
    %c0_i32 = arith.constant 0 : i32
    %c0_i32_0 = arith.constant 0 : i32
    %c0_i32_1 = arith.constant 0 : i32
    return %c0_i32, %c0_i32_0 : i32, i32
  }
  func.func @transform_2(%arg0: i32) -> (i32, i32) {
    %c0_i32 = arith.constant 0 : i32
    %c0_i32_0 = arith.constant 0 : i32
    %c0_i32_1 = arith.constant 0 : i32
    return %c0_i32, %c0_i32_0 : i32, i32
  }
  func.func @transform_3(%arg0: i32) -> (i32, i32) {
    %c0_i32 = arith.constant 0 : i32
    %c0_i32_0 = arith.constant 0 : i32
    %c0_i32_1 = arith.constant 0 : i32
    return %c0_i32, %c0_i32_0 : i32, i32
  }
  func.func @transform_4(%arg0: i32) -> (i32, i32) {
    %c0_i32 = arith.constant 0 : i32
    %c0_i32_0 = arith.constant 0 : i32
    %c0_i32_1 = arith.constant 0 : i32
    return %c0_i32, %c0_i32_0 : i32, i32
  }
  func.func @transform_5(%arg0: i32) -> (i32, i32) {
    %c0_i32 = arith.constant 0 : i32
    %c0_i32_0 = arith.constant 0 : i32
    return %arg0, %c0_i32 : i32, i32
  }
}

</mosaic_0001>

<bundles_post_ra>
// kernel: tpu_custom_call.1
= control target key start
LH: loop header
LB: loop body
LE: loop exit
PB: predicated region body
PF: predicated region fallthrough
CT: control target
= control target key end

     0   :  { %10 = vsyncpa [#allocation3], 0  ;;  %s2435_s0 = inlined_call_operand.hbm [shape: f32[512,256], index: 0, kind: input, shape index: {}]   ;;  %s2436_s1 = inlined_call_operand.hbm [shape: bf16[256,256], index: 1, kind: input, shape index: {}]   ;;  %s2437_s2 = inlined_call_operand.vmem [shape: f32[1,256], index: 2, kind: input, shape index: {}]   ;;  %s2438_s3 = inlined_call_operand.vmem [shape: f32[1,256], index: 3, kind: input, shape index: {}]   ;;  %s2439_s4 = inlined_call_operand.vmem [shape: f32[1,256], index: 4, kind: input, shape index: {}]   ;;  %s2440_s5 = inlined_call_operand.hbm [shape: f32[512,256], index: 5, kind: output, shape index: {}]  }
   0x1   :  { %12 = vsyncpa [#allocation3 + $0x1], 0 }
   0x2   :  { %13 = vsyncpa [#allocation6], 0 }
   0x3   :  { %14 = vsyncpa [#allocation4], 0 }
   0x4   :  { %16 = vsyncpa [#allocation4 + $0x1], 0  ;;  %s1562_s18 = smov 0   ;;  %s1564_s19 = smov 0  }
   0x5   :  { %s1566_s20 = smov 0   ;;  %s1568_s21 = smov 0  }
   0x6 LB: > { %s1583_s22 = sadd.s32 4294967295, %s1521_s21   ;;  %s1196_s23 = sadd.s32 4294967294, %s1521_s21   ;;  %s1521_s21 = sphi %s1568_s21, %s2538_s21   ;;  %s1517_s20 = sphi %s1566_s20, %s2537_s20   ;;  %s1513_s19 = sphi %s1564_s19, %s2536_s19   ;;  %s1509_s18 = sphi %s1562_s18, %s2535_s18  }
   0x7   : > { %p42_p0 = scmp.ne.s32.totalorder %s1513_s19, %s1509_s18  ;;  %p2441_p1 = scmp.eq.s32.totalorder %s1583_s22, 0 }
   0x8   : > { %p156_p3 = scmp.eq.s32.totalorder %s1196_s23, 1  ;;  %p1197_p5 = scmp.ge.s32.totalorder %s1521_s21, 1 }
   0x9   : > { %p1592_p4 = por %p2441_p1, %p42_p0  ;;  %p163_p7 = scmp.lt.s32.totalorder %s1521_s21, 3 }
   0xa   : > { %p1597_p6 = por %p156_p3, %p42_p0  ;;  %s1523_s27 = smov [#allocation5]  }
   0xb   : > { %s2470_s24 = scalar_select %p1592_p4, 1, 0 }
   0xc   : > { %s2471_s25 = scalar_select %p1597_p6, 1, 0 }
   0xd   : > { %p1602_p8 = pnand %p1197_p5, %p163_p7  ;;  %s175_s28 = sshll.u32 %s1523_s27, 4  ;;  %s1606_s28 = int_to_ptr.vmem [resolvable:$true] %s175_s28 }
   0xe   : > { %s1618_s30 = sadd.s32 1, %s1521_s21   ;;  %s29_s6 = sadd.s32 1, %s1517_s20 }
   0xf   : > { %s2472_s26 = scalar_select %p1602_p8, 1, 0 }
  0x10   : > { %p1290_p9 = pneg %p1602_p8  ;;  %s26_s7 = ssub.s32 %s1521_s21, %s1618_s30 }
  0x11   : > { %s1393_s10 = scalar_lea.hbm %s2436_s1, 4096 }
  0x12   : > { %p1613_p11 = pnand %p1290_p9, %p2441_p1  ;;  %p1394_p12 = scmp.ne.s32.totalorder %s2436_s1, %s1393_s10 }
  0x13   : > { %p1400_p5 = scmp.lt.u32.totalorder %s1393_s10, %s2436_s1 }
  0x14   : > { %p1395_p13 = pneg %p1613_p11 }
  0x16   : > { %p1396_p0 = pnand %p1395_p13, %p1394_p12 }
  0x18   : > { %p1397_p3 = pneg %p1396_p0 }
  0x1a   : > { %p1402_p7 = pnand %p1400_p5, %p1397_p3 }
  0x1c   : > { %1405 = shalt.err (!%p1402_p7)
}
  0x1d   : > { %s1406_s15 = scalar_lea.vmem %s1606_s28, 4096  ;;  %p1414_p2 = scmp.lt.s32.totalorder %s1606_s28, %s1606_s28 }
  0x1e   : > { %p1407_p9 = scmp.ne.s32.totalorder %s1606_s28, %s1406_s15  ;;  %p1415_p6 = scmp.lt.s32.totalorder %s1406_s15, %s1406_s15 }
  0x20   : > { %p1409_p10 = pnand %p1407_p9, %p1395_p13  ;;  %p1416_p4 = por %p1415_p6, %p1414_p2 }
  0x22   : > { %p1410_p1 = pneg %p1409_p10 }
  0x24   : > { %p1417_p8 = pnand %p1416_p4, %p1410_p1 }
  0x26   : > { %1420 = shalt.err (!%p1417_p8)
}
  0x27   : > { %s1524_s16 = smov 128   ;;  %s1525_s17 = smov 8  }
  0x28   : > { %1293 = dma.hbm_to_vmem [thread:$0]  (!%p1613_p11), %s2436_s1, 4096, %s1606_s28, [#allocation6], %s1524_s16, %s1524_s16, %s1525_s17  }
  0x29   : > { %p27_p2 = scmp.eq.s32.totalorder %s26_s7, 0  ;;  %p36_p1 = scmp.ne.s32.totalorder %s1517_s20, %s1513_s19 }
  0x2a   : > { %p37_p4 = scmp.eq.s32.totalorder %s1521_s21, 0  ;;  %p1303_p6 = scmp.lt.s32.totalorder %s1521_s21, 2 }
  0x2b   : > { %s1649_s8 = scalar_select %p27_p2, %s1517_s20, %s29_s6  }
  0x2c   : > { %p38_p8 = por %p37_p4, %p36_p1  ;;  %p2474_p10 = scmp.eq.s32.totalorder %s1583_s22, 1 }
  0x2d   : > { %s198_s10 = sand.u32 1, %s1517_s20   ;;  %s1247_s11 = sshll.u32 %s1521_s21, 13 }
  0x2e   : > { %p1653_p12 = por %p2474_p10, %p36_p1  ;;  %s1200_s12 = sshll.u32 %s198_s10, 9 }
  0x2f   : > { %s1662_s14 = scalar_lea.hbm %s2435_s0, %s1247_s11  ;;  %s202_s28 = scalar_lea.vmem [#allocation2], %s1200_s12 }
  0x30   : > { %s210_s6 = sshll.u32 %s202_s28, 4  ;;  %p1664_p11 = pnand %p1303_p6, %p38_p8  ;;  %s1668_s6 = int_to_ptr.vmem [resolvable:$true] %s210_s6 }
  0x31   : > { %s1670_s15 = scalar_lea.sflag [#allocation3], %s198_s10  ;;  %s1421_s16 = scalar_lea.hbm %s1662_s14, 8192 }
  0x32   : > { %p1422_p13 = scmp.ne.s32.totalorder %s1662_s14, %s1421_s16  ;;  %p1423_p0 = pneg %p1664_p11 }
  0x33   : > { %s1426_s27 = scalar_lea.hbm %s2435_s0, 16384  ;;  %p1427_p7 = scmp.lt.u32.totalorder %s1662_s14, %s2435_s0 }
  0x34   : > { %p1424_p3 = pnand %p1423_p0, %p1422_p13  ;;  %p1428_p9 = scmp.lt.u32.totalorder %s1426_s27, %s1421_s16 }
  0x35   : > { %p1430_p1 = scmp.lt.u32.totalorder %s1421_s16, %s1662_s14 }
  0x36   : > { %p1425_p5 = pneg %p1424_p3  ;;  %p1429_p2 = por %p1428_p9, %p1427_p7 }
  0x38   : > { %p1431_p4 = por %p1430_p1, %p1429_p2 }
  0x3a   : > { %p1432_p6 = pnand %p1431_p4, %p1425_p5 }
  0x3c   : > { %1435 = shalt.err (!%p1432_p6)
}
  0x3d   : > { %s1436_s10 = scalar_lea.vmem %s1668_s6, 8192  ;;  %s1526_s29 = smov [#allocation2]  }
  0x3e   : > { %p1437_p8 = scmp.ne.s32.totalorder %s1668_s6, %s1436_s10  ;;  %s1441_s13 = sshll.u32 %s1526_s29, 4  ;;  %s1442_s13 = int_to_ptr.vmem [resolvable:$false] %s1441_s13 }
  0x3f   : > { %s1443_s28 = scalar_lea.vmem %s1442_s13, 16384  ;;  %p1444_p3 = scmp.lt.s32.totalorder %s1668_s6, %s1442_s13 }
  0x40   : > { %p1439_p10 = pnand %p1437_p8, %p1423_p0  ;;  %p1445_p7 = scmp.lt.s32.totalorder %s1443_s28, %s1436_s10 }
  0x42   : > { %p1440_p13 = pneg %p1439_p10  ;;  %p1446_p9 = por %p1445_p7, %p1444_p3 }
  0x44   : > { %p1447_p2 = pnand %p1446_p9, %p1440_p13 }
  0x46   : > { %1450 = shalt.err (!%p1447_p2)
}
  0x47   : > { %s1527_s16 = smov 256   ;;  %s1528_s17 = smov 16  }
  0x48   : > { %1297 = dma.hbm_to_vmem [thread:$0]  (!%p1664_p11), %s1662_s14, 8192, %s1668_s6, %s1670_s15, %s1527_s16, %s1527_s16, %s1528_s17  }
  0x49   : > { %p2477_p0 = scmp.ne.s32.totalorder %s2472_s26, 0 }
  0x4b   : > { %222 = sbr.rel (%p2477_p0) target bundleno = 468 (0x1d4), region = 40 }
  0x52   : > { %s1701_s23 = sand.u32 1, %s1513_s19   ;;  %p2478_p5 = scmp.ne.s32.totalorder %s2470_s24, 0 }
  0x53   : > { %s1205_s27 = sshll.u32 %s1701_s23, 9  ;;  %s225_s11 = scalar_lea.sflag [#allocation3], %s1701_s23 }
  0x54   : > { %s1707_s12 = scalar_lea.vmem [#allocation2], %s1205_s27 }
  0x55   : > { %1496 = dma.done.wait (%p2478_p5), %s225_s11, 8192  }
  0x56   : > { %1498 = vsyncadd (%p2478_p5), %s225_s11, 4294959104  ;;  %p2479_p11 = scmp.eq.s32.totalorder %s1583_s22, 0 }
  0x58   : > { %1500 = dma.done.wait (%p2479_p11), [#allocation6], 4096   ;;  %p2480_p1 = pmov %p2479_p11 }
  0x59   : > { %v1345_v0 = vld [vmem:[#allocation5 + $0x4] ss:$8 sps:$4 sm:$0xff]   ;;  %v1347_v1 = vld [vmem:[#allocation5] ss:$8 sps:$4 sm:$0xff]   ;;  %v1348_v2 = vld [vmem:[#allocation5 + $0x14] ss:$8 sps:$4 sm:$0xff]  }
  0x5a   : > { %1502 = vsyncadd (%p2480_p1), [#allocation6], 4294963200  ;;  %561 = vmatprep.subr.bf16.mxu0 %v1345_v0  ;;  %1250 = vmatprep.subr.bf16.mxu1 %v1345_v0  ;;  %v1350_v3 = vld [vmem:[#allocation5 + $0x10] ss:$8 sps:$4 sm:$0xff]   ;;  %v1351_v4 = vld [vmem:[#allocation5 + $0x24] ss:$8 sps:$4 sm:$0xff]  }
  0x5b   : > { %562 = vmatpush1.bf16.msra.mxu0 %v1347_v1  ;;  %1266 = vmatpush1.bf16.msra.mxu1 %v1347_v1  ;;  %v1353_v5 = vld [vmem:[#allocation5 + $0x20] ss:$8 sps:$4 sm:$0xff]   ;;  %v1354_v6 = vld [vmem:[#allocation5 + $0x34] ss:$8 sps:$4 sm:$0xff]   ;;  %v1356_v7 = vld [vmem:[#allocation5 + $0x30] ss:$8 sps:$4 sm:$0xff]  }
  0x5c   : > { %563 = vmatprep.subr.bf16.mxu0 %v1348_v2  ;;  %1251 = vmatprep.subr.bf16.mxu1 %v1348_v2  ;;  %v1357_v8 = vld [vmem:[#allocation5 + $0x44] ss:$8 sps:$4 sm:$0xff]   ;;  %v1359_v9 = vld [vmem:[#allocation5 + $0x40] ss:$8 sps:$4 sm:$0xff]   ;;  %v1360_v10 = vld [vmem:[#allocation5 + $0x54] ss:$8 sps:$4 sm:$0xff]  }
  0x5d   : > { %v1362_v11 = vld [vmem:[#allocation5 + $0x50] ss:$8 sps:$4 sm:$0xff]   ;;  %v1363_v12 = vld [vmem:[#allocation5 + $0x64] ss:$8 sps:$4 sm:$0xff]   ;;  %v1365_v18 = vld [vmem:[#allocation5 + $0x60] ss:$8 sps:$4 sm:$0xff]  }
  0x5e   : > { %v1718_v13 = vld [vmem:[%s1707_s12 + $0x8] sm:$0xff]  ;;  %v1721_v14 = vld [vmem:[%s1707_s12 + $0x18] sm:$0xff]  ;;  %v1734_v38 = vld [vmem:[%s1707_s12] sm:$0xff]  ;;  %s2028_s10 = scalar_lea.vmem [#allocation7], %s1205_s27  ;;  %s1249_s29 = sshll.u32 %s1583_s22, 13 }
  0x5f   : > { %564 = vmatpush1.bf16.msra.mxu0 %v1350_v3  ;;  %1267 = vmatpush1.bf16.msra.mxu1 %v1350_v3  ;;  %v326_v15 = vpack.c.bf16 %v1721_v14, %v1718_v13  ;;  %v1726_v16 = vld [vmem:[%s1707_s12 + $0x108] sm:$0xff]  ;;  %v1729_v17 = vld [vmem:[%s1707_s12 + $0x118] sm:$0xff]  ;;  %v1737_v39 = vld [vmem:[%s1707_s12 + $0x10] sm:$0xff]  ;;  %s1113_s13 = sshll.u32 %s2028_s10, 4  ;;  %s2383_s16 = scalar_lea.hbm %s2440_s5, %s1249_s29  ;;  %s2385_s13 = int_to_ptr.vmem [resolvable:$true] %s1113_s13 }
  0x60   : > { %565 = vmatprep.subr.bf16.mxu0 %v1351_v4  ;;  %1252 = vmatprep.subr.bf16.mxu1 %v1351_v4  ;;  %v342_v19 = vpack.c.bf16 %v1729_v17, %v1726_v16  ;;  %v1366_v20 = vld [vmem:[#allocation5 + $0x74] ss:$8 sps:$4 sm:$0xff]   ;;  %v1368_v21 = vld [vmem:[#allocation5 + $0x70] ss:$8 sps:$4 sm:$0xff]   ;;  %v1369_v22 = vld [vmem:[#allocation5 + $0x84] ss:$8 sps:$4 sm:$0xff]   ;;  %v325_v46 = vpack.c.bf16 %v1737_v39, %v1734_v38 }
  0x61   : > { %593 = vmatprep.mubr.bf16.mxu0 %v326_v15  ;;  %v1371_v23 = vld [vmem:[#allocation5 + $0x80] ss:$8 sps:$4 sm:$0xff]   ;;  %v1372_v24 = vld [vmem:[#allocation5 + $0x94] ss:$8 sps:$4 sm:$0xff]   ;;  %v1374_v25 = vld [vmem:[#allocation5 + $0x90] ss:$8 sps:$4 sm:$0xff]  }
  0x62   : > { %673 = vmatprep.mubr.bf16.mxu1 %v342_v19  ;;  %v1375_v26 = vld [vmem:[#allocation5 + $0xa4] ss:$8 sps:$4 sm:$0xff]   ;;  %v1377_v27 = vld [vmem:[#allocation5 + $0xa0] ss:$8 sps:$4 sm:$0xff]   ;;  %v1378_v28 = vld [vmem:[#allocation5 + $0xb4] ss:$8 sps:$4 sm:$0xff]  }
  0x63   : > { %566 = vmatpush1.bf16.msra.mxu0 %v1353_v5  ;;  %1268 = vmatpush1.bf16.msra.mxu1 %v1353_v5  ;;  %v1380_v29 = vld [vmem:[#allocation5 + $0xb0] ss:$8 sps:$4 sm:$0xff]   ;;  %v1381_v30 = vld [vmem:[#allocation5 + $0xc4] ss:$8 sps:$4 sm:$0xff]   ;;  %v1383_v31 = vld [vmem:[#allocation5 + $0xc0] ss:$8 sps:$4 sm:$0xff]  }
  0x64   : > { %567 = vmatprep.subr.bf16.mxu0 %v1354_v6  ;;  %1253 = vmatprep.subr.bf16.mxu1 %v1354_v6  ;;  %v1384_v32 = vld [vmem:[#allocation5 + $0xd4] ss:$8 sps:$4 sm:$0xff]   ;;  %v1386_v33 = vld [vmem:[#allocation5 + $0xd0] ss:$8 sps:$4 sm:$0xff]   ;;  %v1387_v34 = vld [vmem:[#allocation5 + $0xe4] ss:$8 sps:$4 sm:$0xff]  }
  0x65   : > { %v1389_v35 = vld [vmem:[#allocation5 + $0xe0] ss:$8 sps:$4 sm:$0xff]   ;;  %v1390_v36 = vld [vmem:[#allocation5 + $0xf4] ss:$8 sps:$4 sm:$0xff]   ;;  %v1392_v37 = vld [vmem:[#allocation5 + $0xf0] ss:$8 sps:$4 sm:$0xff]  }
  0x66   : > { %v1740_v40 = vld [vmem:[%s1707_s12 + $0x100] sm:$0xff]  ;;  %v1743_v41 = vld [vmem:[%s1707_s12 + $0x110] sm:$0xff]  ;;  %v1746_v42 = vld [vmem:[%s1707_s12 + $0x28] sm:$0xff]  ;;  %s1099_s17 = scalar_lea.sflag [#allocation4], %s1701_s23  ;;  %s1451_s27 = scalar_lea.vmem %s2385_s13, 8192 }
  0x67   : > { %568 = vmatpush1.bf16.msra.mxu0 %v1356_v7  ;;  %1269 = vmatpush1.bf16.msra.mxu1 %v1356_v7  ;;  %v1749_v43 = vld [vmem:[%s1707_s12 + $0x38] sm:$0xff]  ;;  %v1752_v44 = vld [vmem:[%s1707_s12 + $0x128] sm:$0xff]  ;;  %v341_v47 = vpack.c.bf16 %v1743_v41, %v1740_v40  ;;  %v1766_v50 = vld [vmem:[%s1707_s12 + $0x20] sm:$0xff]  ;;  %p1452_p4 = scmp.ne.s32.totalorder %s2385_s13, %s1451_s27  ;;  %s1529_s11 = smov [#allocation7]  }
  0x68   : > { %569 = vmatprep.subr.bf16.mxu0 %v1357_v8  ;;  %1254 = vmatprep.subr.bf16.mxu1 %v1357_v8  ;;  %v1755_v45 = vld [vmem:[%s1707_s12 + $0x138] sm:$0xff]  ;;  %v328_v48 = vpack.c.bf16 %v1749_v43, %v1746_v42  ;;  %v1769_v51 = vld [vmem:[%s1707_s12 + $0x30] sm:$0xff]  ;;  %v1772_v52 = vld [vmem:[%s1707_s12 + $0x120] sm:$0xff] }
  0x69   : > { %v344_v49 = vpack.c.bf16 %v1755_v45, %v1752_v44  ;;  %v1775_v53 = vld [vmem:[%s1707_s12 + $0x130] sm:$0xff]  ;;  %v1778_v54 = vld [vmem:[%s1707_s12 + $0x48] sm:$0xff]  ;;  %v1781_v55 = vld [vmem:[%s1707_s12 + $0x58] sm:$0xff]  ;;  %v327_v58 = vpack.c.bf16 %v1769_v51, %v1766_v50  ;;  %p1453_p6 = pnand %p1452_p4, %p1653_p12 }
  0x6a   : > { %v1784_v56 = vld [vmem:[%s1707_s12 + $0x148] sm:$0xff]  ;;  %v1787_v57 = vld [vmem:[%s1707_s12 + $0x158] sm:$0xff]  ;;  %v343_v59 = vpack.c.bf16 %v1775_v53, %v1772_v52  ;;  %v330_v60 = vpack.c.bf16 %v1781_v55, %v1778_v54  ;;  %v1798_v62 = vld [vmem:[%s1707_s12 + $0x40] sm:$0xff] }
  0x6b   : > { %570 = vmatpush1.bf16.msra.mxu0 %v1359_v9  ;;  %1270 = vmatpush1.bf16.msra.mxu1 %v1359_v9  ;;  %v346_v61 = vpack.c.bf16 %v1787_v57, %v1784_v56  ;;  %v1801_v63 = vld [vmem:[%s1707_s12 + $0x50] sm:$0xff]  ;;  %v1804_v0 = vld [vmem:[%s1707_s12 + $0x140] sm:$0xff]  ;;  %v1810_v2 = vld [vmem:[%s1707_s12 + $0x68] sm:$0xff]  ;;  %p1454_p8 = pneg %p1453_p6 }
  0x6c   : > { %571 = vmatprep.subr.bf16.mxu0 %v1360_v10  ;;  %1255 = vmatprep.subr.bf16.mxu1 %v1360_v10  ;;  %v1807_v1 = vld [vmem:[%s1707_s12 + $0x150] sm:$0xff]  ;;  %v1813_v3 = vld [vmem:[%s1707_s12 + $0x78] sm:$0xff]  ;;  %v1816_v4 = vld [vmem:[%s1707_s12 + $0x168] sm:$0xff]  ;;  %v329_v6 = vpack.c.bf16 %v1801_v63, %v1798_v62 }
  0x6d   : > { %v1819_v5 = vld [vmem:[%s1707_s12 + $0x178] sm:$0xff]  ;;  %v345_v7 = vpack.c.bf16 %v1807_v1, %v1804_v0  ;;  %v332_v8 = vpack.c.bf16 %v1813_v3, %v1810_v2  ;;  %v1830_v10 = vld [vmem:[%s1707_s12 + $0x60] sm:$0xff]  ;;  %v1839_v15 = vld [vmem:[%s1707_s12 + $0x170] sm:$0xff] }
  0x6e   : > { %v348_v9 = vpack.c.bf16 %v1819_v5, %v1816_v4  ;;  %v1845_v19 = vld [vmem:[%s1707_s12 + $0x98] sm:$0xff] }
  0x6f   : > { %572 = vmatpush1.bf16.msra.mxu0 %v1362_v11  ;;  %1271 = vmatpush1.bf16.msra.mxu1 %v1362_v11  ;;  %v1833_v11 = vld [vmem:[%s1707_s12 + $0x70] sm:$0xff]  ;;  %2481 = vst [vmem:[#allocation11_spill] sm:$0xff] %v1845_v19 }
  0x70   : > { %573 = vmatprep.subr.bf16.mxu0 %v1363_v12  ;;  %1256 = vmatprep.subr.bf16.mxu1 %v1363_v12  ;;  %v1836_v12 = vld [vmem:[%s1707_s12 + $0x160] sm:$0xff] }
  0x73   : > { %574 = vmatpush1.bf16.msra.mxu0 %v1365_v18  ;;  %1272 = vmatpush1.bf16.msra.mxu1 %v1365_v18  ;;  %v1842_v18 = vld [vmem:[%s1707_s12 + $0x88] sm:$0xff] }
  0x74   : > { %575 = vmatprep.subr.bf16.mxu0 %v1366_v20  ;;  %1257 = vmatprep.subr.bf16.mxu1 %v1366_v20  ;;  %v1848_v20 = vld [vmem:[%s1707_s12 + $0x188] sm:$0xff] }
  0x77   : > { %576 = vmatpush1.bf16.msra.mxu0 %v1368_v21  ;;  %1273 = vmatpush1.bf16.msra.mxu1 %v1368_v21  ;;  %v1851_v21 = vld [vmem:[%s1707_s12 + $0x198] sm:$0xff] }
  0x78   : > { %577 = vmatprep.subr.bf16.mxu0 %v1369_v22  ;;  %1258 = vmatprep.subr.bf16.mxu1 %v1369_v22  ;;  %2482 = vst [vmem:[#allocation12_spill] sm:$0xff] %v1851_v21  ;;  %v331_v22 = vpack.c.bf16 %v1833_v11, %v1830_v10 }
  0x7b   : > { %578 = vmatpush1.bf16.msra.mxu0 %v1371_v23  ;;  %1274 = vmatpush1.bf16.msra.mxu1 %v1371_v23  ;;  %v347_v23 = vpack.c.bf16 %v1839_v15, %v1836_v12 }
  0x7c   : > { %579 = vmatprep.subr.bf16.mxu0 %v1372_v24  ;;  %1259 = vmatprep.subr.bf16.mxu1 %v1372_v24  ;;  %v334_v24 = vpack.c.bf16 %v1845_v19, %v1842_v18 }
  0x7f   : > { %580 = vmatpush1.bf16.msra.mxu0 %v1374_v25  ;;  %1275 = vmatpush1.bf16.msra.mxu1 %v1374_v25  ;;  %v350_v25 = vpack.c.bf16 %v1851_v21, %v1848_v20 }
  0x80   : > { %581 = vmatprep.subr.bf16.mxu0 %v1375_v26  ;;  %1260 = vmatprep.subr.bf16.mxu1 %v1375_v26  ;;  %v1862_v26 = vld [vmem:[%s1707_s12 + $0x80] sm:$0xff] }
  0x83   : > { %582 = vmatpush1.bf16.msra.mxu0 %v1377_v27  ;;  %1276 = vmatpush1.bf16.msra.mxu1 %v1377_v27  ;;  %v1865_v27 = vld [vmem:[%s1707_s12 + $0x90] sm:$0xff] }
  0x84   : > { %583 = vmatprep.subr.bf16.mxu0 %v1378_v28  ;;  %1261 = vmatprep.subr.bf16.mxu1 %v1378_v28  ;;  %v1868_v28 = vld [vmem:[%s1707_s12 + $0x180] sm:$0xff] }
  0x87   : > { %584 = vmatpush1.bf16.msra.mxu0 %v1380_v29  ;;  %1277 = vmatpush1.bf16.msra.mxu1 %v1380_v29  ;;  %v1871_v29 = vld [vmem:[%s1707_s12 + $0x190] sm:$0xff] }
  0x88   : > { %585 = vmatprep.subr.bf16.mxu0 %v1381_v30  ;;  %1262 = vmatprep.subr.bf16.mxu1 %v1381_v30  ;;  %v1874_v30 = vld [vmem:[%s1707_s12 + $0xa8] sm:$0xff] }
  0x89   : > { %2483 = vst [vmem:[#allocation13_spill] sm:$0xff] %v1874_v30 }
  0x8b   : > { %586 = vmatpush1.bf16.msra.mxu0 %v1383_v31  ;;  %1278 = vmatpush1.bf16.msra.mxu1 %v1383_v31  ;;  %v1877_v31 = vld [vmem:[%s1707_s12 + $0xb8] sm:$0xff] }
  0x8c   : > { %587 = vmatprep.subr.bf16.mxu0 %v1384_v32  ;;  %1263 = vmatprep.subr.bf16.mxu1 %v1384_v32  ;;  %2484 = vst [vmem:[#allocation14_spill] sm:$0xff] %v1877_v31  ;;  %v1880_v32 = vld [vmem:[%s1707_s12 + $0x1a8] sm:$0xff] }
  0x8d   : > { %2485 = vst [vmem:[#allocation15_spill] sm:$0xff] %v1880_v32 }
  0x8f   : > { %588 = vmatpush1.bf16.msra.mxu0 %v1386_v33  ;;  %1279 = vmatpush1.bf16.msra.mxu1 %v1386_v33  ;;  %v1883_v33 = vld [vmem:[%s1707_s12 + $0x1b8] sm:$0xff] }
  0x90   : > { %589 = vmatprep.subr.bf16.mxu0 %v1387_v34  ;;  %1264 = vmatprep.subr.bf16.mxu1 %v1387_v34  ;;  %2486 = vst [vmem:[#allocation16_spill] sm:$0xff] %v1883_v33  ;;  %v333_v34 = vpack.c.bf16 %v1865_v27, %v1862_v26 }
  0x93   : > { %590 = vmatpush1.bf16.msra.mxu0 %v1389_v35  ;;  %1280 = vmatpush1.bf16.msra.mxu1 %v1389_v35  ;;  %v349_v35 = vpack.c.bf16 %v1871_v29, %v1868_v28 }
  0x94   : > { %591 = vmatprep.subr.bf16.mxu0 %v1390_v36  ;;  %1265 = vmatprep.subr.bf16.mxu1 %v1390_v36  ;;  %v336_v36 = vpack.c.bf16 %v1877_v31, %v1874_v30 }
  0x97   : > { %592 = vmatpush1.bf16.msra.mxu0 %v1392_v37  ;;  %1281 = vmatpush1.bf16.msra.mxu1 %v1392_v37  ;;  %v352_v37 = vpack.c.bf16 %v1883_v33, %v1880_v32 }
  0x9a   : > { %594 = vmatmul.mubr.bf16.vlgmr.msra.gmra.mrb[0].mxu0 %v325_v46  ;;  %674 = vmatmul.mubr.bf16.vlgmr.msra.gmra.mrb[0].mxu1 %v341_v47  ;;  %v1894_v46 = vld [vmem:[%s1707_s12 + $0xa0] sm:$0xff]  ;;  %v1897_v47 = vld [vmem:[%s1707_s12 + $0xb0] sm:$0xff] }
  0x9b   : > { %603 = vmatprep.mubr.bf16.mxu0 %v328_v48  ;;  %683 = vmatprep.mubr.bf16.mxu1 %v344_v49  ;;  %2487 = vst [vmem:[#allocation17_spill] sm:$0xff] %v1894_v46  ;;  %2488 = vst [vmem:[#allocation18_spill] sm:$0xff] %v1897_v47  ;;  %v1900_v48 = vld [vmem:[%s1707_s12 + $0x1a0] sm:$0xff]  ;;  %v1903_v49 = vld [vmem:[%s1707_s12 + $0x1b0] sm:$0xff] }
  0x9c   : > { %2489 = vst [vmem:[#allocation19_spill] sm:$0xff] %v1900_v48  ;;  %2490 = vst [vmem:[#allocation20_spill] sm:$0xff] %v1903_v49 }
  0xa2   : > { %604 = vmatmul.mubr.bf16.gmra.mrb[4].mxu0 %v327_v58  ;;  %684 = vmatmul.mubr.bf16.gmra.mrb[4].mxu1 %v343_v59  ;;  %v1906_v58 = vld [vmem:[%s1707_s12 + $0xc8] sm:$0xff]  ;;  %v1909_v59 = vld [vmem:[%s1707_s12 + $0xd8] sm:$0xff] }
  0xa3   : > { %613 = vmatprep.mubr.bf16.mxu0 %v330_v60  ;;  %693 = vmatprep.mubr.bf16.mxu1 %v346_v61  ;;  %2491 = vst [vmem:[#allocation21_spill] sm:$0xff] %v1906_v58  ;;  %2492 = vst [vmem:[#allocation22_spill] sm:$0xff] %v1909_v59  ;;  %v1912_v60 = vld [vmem:[%s1707_s12 + $0x1c8] sm:$0xff]  ;;  %v1915_v61 = vld [vmem:[%s1707_s12 + $0x1d8] sm:$0xff] }
  0xa4   : > { %2493 = vst [vmem:[#allocation23_spill] sm:$0xff] %v1912_v60  ;;  %2494 = vst [vmem:[#allocation24_spill] sm:$0xff] %v1915_v61 }
  0xaa   : > { %614 = vmatmul.mubr.bf16.gmra.mrb[8].mxu0 %v329_v6  ;;  %694 = vmatmul.mubr.bf16.gmra.mrb[8].mxu1 %v345_v7  ;;  %v335_v6 = vpack.c.bf16 %v1897_v47, %v1894_v46  ;;  %v351_v7 = vpack.c.bf16 %v1903_v49, %v1900_v48 }
  0xab   : > { %623 = vmatprep.mubr.bf16.mxu0 %v332_v8  ;;  %703 = vmatprep.mubr.bf16.mxu1 %v348_v9  ;;  %v338_v8 = vpack.c.bf16 %v1909_v59, %v1906_v58  ;;  %v354_v9 = vpack.c.bf16 %v1915_v61, %v1912_v60  ;;  %v1958_v61 = vld [vmem:[%s1707_s12 + $0xe0] sm:$0xff]  ;;  %v1961_v59 = vld [vmem:[%s1707_s12 + $0xf0] sm:$0xff] }
  0xac   : > { %2503 = vst [vmem:[#allocation33_spill] sm:$0xff] %v1958_v61  ;;  %2504 = vst [vmem:[#allocation34_spill] sm:$0xff] %v1961_v59  ;;  %v1964_v60 = vld [vmem:[%s1707_s12 + $0x1e0] sm:$0xff] }
  0xad   : > { %2505 = vst [vmem:[#allocation35_spill] sm:$0xff] %v1964_v60 }
  0xb2   : > { %624 = vmatmul.mubr.bf16.gmra.mrb[12].mxu0 %v331_v22  ;;  %704 = vmatmul.mubr.bf16.gmra.mrb[12].mxu1 %v347_v23  ;;  %v1926_v22 = vld [vmem:[%s1707_s12 + $0xc0] sm:$0xff]  ;;  %v1929_v23 = vld [vmem:[%s1707_s12 + $0xd0] sm:$0xff] }
  0xb3   : > { %633 = vmatprep.mubr.bf16.mxu0 %v334_v24  ;;  %713 = vmatprep.mubr.bf16.mxu1 %v350_v25  ;;  %2495 = vst [vmem:[#allocation25_spill] sm:$0xff] %v1926_v22  ;;  %2496 = vst [vmem:[#allocation26_spill] sm:$0xff] %v1929_v23  ;;  %v1932_v24 = vld [vmem:[%s1707_s12 + $0x1c0] sm:$0xff]  ;;  %v1935_v25 = vld [vmem:[%s1707_s12 + $0x1d0] sm:$0xff] }
  0xb4   : > { %2497 = vst [vmem:[#allocation27_spill] sm:$0xff] %v1932_v24  ;;  %2498 = vst [vmem:[#allocation28_spill] sm:$0xff] %v1935_v25 }
  0xba   : > { %634 = vmatmul.mubr.bf16.gmra.mrb[16].mxu0 %v333_v34  ;;  %714 = vmatmul.mubr.bf16.gmra.mrb[16].mxu1 %v349_v35  ;;  %v1938_v34 = vld [vmem:[%s1707_s12 + $0xe8] sm:$0xff]  ;;  %v1941_v35 = vld [vmem:[%s1707_s12 + $0xf8] sm:$0xff] }
  0xbb   : > { %643 = vmatprep.mubr.bf16.mxu0 %v336_v36  ;;  %723 = vmatprep.mubr.bf16.mxu1 %v352_v37  ;;  %2499 = vst [vmem:[#allocation29_spill] sm:$0xff] %v1938_v34  ;;  %2500 = vst [vmem:[#allocation30_spill] sm:$0xff] %v1941_v35  ;;  %v1944_v36 = vld [vmem:[%s1707_s12 + $0x1e8] sm:$0xff]  ;;  %v1947_v37 = vld [vmem:[%s1707_s12 + $0x1f8] sm:$0xff] }
  0xbc   : > { %2501 = vst [vmem:[#allocation31_spill] sm:$0xff] %v1944_v36  ;;  %2502 = vst [vmem:[#allocation32_spill] sm:$0xff] %v1947_v37 }
  0xc2   : > { %644 = vmatmul.mubr.bf16.gmra.mrb[20].mxu0 %v335_v6  ;;  %724 = vmatmul.mubr.bf16.gmra.mrb[20].mxu1 %v351_v7  ;;  %v337_v6 = vpack.c.bf16 %v1929_v23, %v1926_v22  ;;  %v353_v7 = vpack.c.bf16 %v1935_v25, %v1932_v24  ;;  %v1967_v23 = vld [vmem:[%s1707_s12 + $0x1f0] sm:$0xff]  ;;  %v339_v25 = vpack.c.bf16 %v1961_v59, %v1958_v61  ;;  %s1455_s12 = sshll.u32 %s1529_s11, 4  ;;  %s1456_s12 = int_to_ptr.vmem [resolvable:$false] %s1455_s12 }
  0xc3   : > { %653 = vmatprep.mubr.bf16.mxu0 %v338_v8  ;;  %733 = vmatprep.mubr.bf16.mxu1 %v354_v9  ;;  %v340_v8 = vpack.c.bf16 %v1941_v35, %v1938_v34  ;;  %v356_v9 = vpack.c.bf16 %v1947_v37, %v1944_v36  ;;  %2506 = vst [vmem:[#allocation36_spill] sm:$0xff] %v1967_v23  ;;  %v754_v36 = vld [vmem:[%s2438_s3] sm:$0x3]  ;;  %s1457_s24 = scalar_lea.vmem %s1456_s12, 16384  ;;  %p1458_p10 = scmp.lt.s32.totalorder %s2385_s13, %s1456_s12 }
  0xc4   : > { %v355_v35 = vpack.c.bf16 %v1967_v23, %v1964_v60  ;;  %v830_v23 = vld [vmem:[%s2439_s4] sm:$0x3]  ;;  %p1459_p13 = scmp.lt.s32.totalorder %s1457_s24, %s1451_s27 }
  0xc6   : > { %p1460_p3 = por %p1459_p13, %p1458_p10 }
  0xc8   : > { %p1461_p7 = pnand %p1460_p3, %p1454_p8 }
  0xca   : > { %654 = vmatmul.mubr.bf16.gmra.mrb[24].mxu0 %v337_v6  ;;  %734 = vmatmul.mubr.bf16.gmra.mrb[24].mxu1 %v353_v7  ;;  %v391_v6 = vlaneseq }
  0xcb   : > { %663 = vmatprep.mubr.bf16.mxu0 %v340_v8  ;;  %743 = vmatprep.mubr.bf16.mxu1 %v356_v9  ;;  %v389_v8 = vld [vmem:[%s2437_s2] sm:$0x3] }
  0xcc   : > { %v392_v7 = vshrl.u32 %v391_v6, 7 }
  0xce   : > { %v393_v37 = vsub.s32 0, %v392_v7  ;;  %v397_v9 = vsub.s32 1, %v392_v7 }
  0xd0   : > { %v1979_v34 = vrot.slane %v389_v8, %v393_v37  ;;  %v1988_v60 = vrot.slane %v754_v36, %v397_v9  ;;  %v1991_v61 = vrot.slane %v830_v23, %v393_v37  ;;  %v1995_v31 = vrot.slane %v830_v23, %v397_v9 }
  0xd2   : > { %664 = vmatmul.mubr.bf16.gmra.mrb[28].mxu0 %v339_v25  ;;  %744 = vmatmul.mubr.bf16.gmra.mrb[28].mxu1 %v355_v35  ;;  %v1984_v25 = vrot.slane %v389_v8, %v397_v9  ;;  %v1986_v35 = vrot.slane %v754_v36, %v393_v37 }
 0x16d   : > { %v595_v6 = vpop.f32.mrb[0].mxu0  ;;  %v675_v59 = vpop.f32.mrb[0].mxu1 }
 0x16e   : > { %v596_v7 = vadd.f32 %v595_v6, %v1979_v34  ;;  %v676_v58 = vadd.f32 %v675_v59, %v1979_v34  ;;  %v597_v24 = vpop.f32.mrb[1].mxu0  ;;  %v677_v22 = vpop.f32.mrb[1].mxu1 }
 0x16f   : > { %v598_v33 = vadd.f32 %v597_v24, %v1984_v25  ;;  %v678_v8 = vadd.f32 %v677_v22, %v1984_v25  ;;  %v599_v49 = vpop.f32.mrb[2].mxu0  ;;  %v679_v47 = vpop.f32.mrb[2].mxu1 }
 0x170   : > { %v766_v32 = vmul.f32 %v1986_v35, %v596_v7  ;;  %v798_v36 = vmul.f32 %v1986_v35, %v676_v58  ;;  %v600_v6 = vadd.f32 %v599_v49, %v1979_v34  ;;  %v680_v37 = vadd.f32 %v679_v47, %v1979_v34  ;;  %v601_v30 = vpop.f32.mrb[3].mxu0  ;;  %v681_v59 = vpop.f32.mrb[3].mxu1 }
 0x171   : > { %v767_v48 = vmul.f32 %v1988_v60, %v598_v33  ;;  %v799_v24 = vmul.f32 %v1988_v60, %v678_v8  ;;  %v602_v23 = vadd.f32 %v601_v30, %v1984_v25  ;;  %v682_v22 = vadd.f32 %v681_v59, %v1984_v25 }
 0x172   : > { %v842_v9 = vadd.f32 %v1991_v61, %v766_v32  ;;  %v874_v7 = vadd.f32 %v1991_v61, %v798_v36  ;;  %v768_v58 = vmul.f32 %v1986_v35, %v600_v6  ;;  %v800_v49 = vmul.f32 %v1986_v35, %v680_v37 }
 0x173   : > { %v843_v47 = vadd.f32 %v1995_v31, %v767_v48  ;;  %v875_v46 = vadd.f32 %v1995_v31, %v799_v24  ;;  %v769_v33 = vmul.f32 %v1988_v60, %v602_v23  ;;  %v801_v8 = vmul.f32 %v1988_v60, %v682_v22 }
 0x174   : > { %v906_v30 = vadd.f32 %v842_v9, %v1734_v38  ;;  %v938_v59 = vadd.f32 %v874_v7, %v1740_v40  ;;  %v844_v32 = vadd.f32 %v1991_v61, %v768_v58  ;;  %v876_v36 = vadd.f32 %v1991_v61, %v800_v49 }
 0x175   : > { %v907_v6 = vadd.f32 %v843_v47, %v1718_v13  ;;  %v939_v37 = vadd.f32 %v875_v46, %v1726_v16  ;;  %v845_v48 = vadd.f32 %v1995_v31, %v769_v33  ;;  %v877_v24 = vadd.f32 %v1995_v31, %v801_v8  ;;  %v605_v23 = vpop.f32.mrb[4].mxu0  ;;  %v685_v21 = vpop.f32.mrb[4].mxu1 }
 0x176   : > { %v970_v22 = vmax.f32 %v906_v30, 0.0  ;;  %v1002_v19 = vmax.f32 %v938_v59, 0.0  ;;  %v908_v38 = vadd.f32 %v844_v32, %v1737_v39  ;;  %v940_v40 = vadd.f32 %v876_v36, %v1743_v41  ;;  %v607_v9 = vpop.f32.mrb[5].mxu0  ;;  %v687_v7 = vpop.f32.mrb[5].mxu1 }
 0x177   : > { %v971_v58 = vmax.f32 %v907_v6, 0.0  ;;  %v1003_v49 = vmax.f32 %v939_v37, 0.0  ;;  %v909_v13 = vadd.f32 %v845_v48, %v1721_v14  ;;  %v941_v16 = vadd.f32 %v877_v24, %v1729_v17  ;;  %v609_v46 = vpop.f32.mrb[6].mxu0  ;;  %v689_v47 = vpop.f32.mrb[6].mxu1 }
 0x178   : > { %1034 = vst [vmem:[%s2028_s10] sm:$0xff] %v970_v22  ;;  %1066 = vst [vmem:[%s2028_s10 + $0x100] sm:$0xff] %v1002_v19  ;;  %v972_v39 = vmax.f32 %v908_v38, 0.0  ;;  %v1004_v41 = vmax.f32 %v940_v40, 0.0  ;;  %v606_v33 = vadd.f32 %v605_v23, %v1979_v34  ;;  %v686_v14 = vadd.f32 %v685_v21, %v1979_v34  ;;  %v611_v17 = vpop.f32.mrb[7].mxu0  ;;  %v691_v8 = vpop.f32.mrb[7].mxu1 }
 0x179   : > { %1035 = vst [vmem:[%s2028_s10 + $0x8] sm:$0xff] %v971_v58  ;;  %1067 = vst [vmem:[%s2028_s10 + $0x108] sm:$0xff] %v1003_v49  ;;  %v973_v30 = vmax.f32 %v909_v13, 0.0  ;;  %v1005_v59 = vmax.f32 %v941_v16, 0.0  ;;  %v608_v32 = vadd.f32 %v607_v9, %v1984_v25  ;;  %v688_v36 = vadd.f32 %v687_v7, %v1984_v25 }
 0x17a   : > { %1036 = vst [vmem:[%s2028_s10 + $0x10] sm:$0xff] %v972_v39  ;;  %1068 = vst [vmem:[%s2028_s10 + $0x110] sm:$0xff] %v1004_v41  ;;  %v770_v19 = vmul.f32 %v1986_v35, %v606_v33  ;;  %v802_v6 = vmul.f32 %v1986_v35, %v686_v14  ;;  %v610_v37 = vadd.f32 %v609_v46, %v1979_v34 }
 0x17b   : > { %v690_v21 = vadd.f32 %v689_v47, %v1979_v34  ;;  %1037 = vst [vmem:[%s2028_s10 + $0x18] sm:$0xff] %v973_v30  ;;  %1069 = vst [vmem:[%s2028_s10 + $0x118] sm:$0xff] %v1005_v59  ;;  %v771_v48 = vmul.f32 %v1988_v60, %v608_v32  ;;  %v803_v24 = vmul.f32 %v1988_v60, %v688_v36 }
 0x17c   : > { %v612_v23 = vadd.f32 %v611_v17, %v1984_v25  ;;  %v692_v22 = vadd.f32 %v691_v8, %v1984_v25  ;;  %v846_v38 = vadd.f32 %v1991_v61, %v770_v19  ;;  %v878_v40 = vadd.f32 %v1991_v61, %v802_v6 }
 0x17d   : > { %v772_v9 = vmul.f32 %v1986_v35, %v610_v37  ;;  %v804_v7 = vmul.f32 %v1986_v35, %v690_v21  ;;  %v847_v58 = vadd.f32 %v1995_v31, %v771_v48  ;;  %v879_v49 = vadd.f32 %v1995_v31, %v803_v24  ;;  %v615_v46 = vpop.f32.mrb[8].mxu0  ;;  %v695_v47 = vpop.f32.mrb[8].mxu1 }
 0x17e   : > { %v773_v13 = vmul.f32 %v1988_v60, %v612_v23  ;;  %v805_v16 = vmul.f32 %v1988_v60, %v692_v22  ;;  %v910_v39 = vadd.f32 %v846_v38, %v1766_v50  ;;  %v942_v41 = vadd.f32 %v878_v40, %v1772_v52  ;;  %v617_v17 = vpop.f32.mrb[9].mxu0  ;;  %v697_v8 = vpop.f32.mrb[9].mxu1 }
 0x17f   : > { %v848_v33 = vadd.f32 %v1991_v61, %v772_v9  ;;  %v880_v14 = vadd.f32 %v1991_v61, %v804_v7  ;;  %v911_v30 = vadd.f32 %v847_v58, %v1746_v42  ;;  %v943_v59 = vadd.f32 %v879_v49, %v1752_v44  ;;  %v619_v19 = vpop.f32.mrb[10].mxu0  ;;  %v699_v50 = vpop.f32.mrb[10].mxu1 }
 0x180   : > { %v849_v32 = vadd.f32 %v1995_v31, %v773_v13  ;;  %v881_v36 = vadd.f32 %v1995_v31, %v805_v16  ;;  %v974_v6 = vmax.f32 %v910_v39, 0.0  ;;  %v1006_v52 = vmax.f32 %v942_v41, 0.0  ;;  %v621_v48 = vpop.f32.mrb[11].mxu0  ;;  %v701_v42 = vpop.f32.mrb[11].mxu1 }
 0x181   : > { %v912_v37 = vadd.f32 %v848_v33, %v1769_v51  ;;  %v944_v21 = vadd.f32 %v880_v14, %v1775_v53  ;;  %v975_v24 = vmax.f32 %v911_v30, 0.0  ;;  %v1007_v44 = vmax.f32 %v943_v59, 0.0 }
 0x182   : > { %v913_v23 = vadd.f32 %v849_v32, %v1749_v43  ;;  %v945_v22 = vadd.f32 %v881_v36, %v1755_v45  ;;  %1038 = vst [vmem:[%s2028_s10 + $0x20] sm:$0xff] %v974_v6  ;;  %1070 = vst [vmem:[%s2028_s10 + $0x120] sm:$0xff] %v1006_v52  ;;  %v616_v51 = vadd.f32 %v615_v46, %v1979_v34 }
 0x183   : > { %v976_v38 = vmax.f32 %v912_v37, 0.0  ;;  %v1008_v40 = vmax.f32 %v944_v21, 0.0  ;;  %v696_v53 = vadd.f32 %v695_v47, %v1979_v34  ;;  %1039 = vst [vmem:[%s2028_s10 + $0x28] sm:$0xff] %v975_v24  ;;  %1071 = vst [vmem:[%s2028_s10 + $0x128] sm:$0xff] %v1007_v44  ;;  %v618_v58 = vadd.f32 %v617_v17, %v1984_v25 }
 0x184   : > { %v977_v9 = vmax.f32 %v913_v23, 0.0  ;;  %v1009_v7 = vmax.f32 %v945_v22, 0.0  ;;  %v698_v43 = vadd.f32 %v697_v8, %v1984_v25  ;;  %v774_v45 = vmul.f32 %v1986_v35, %v616_v51 }
 0x185   : > { %1040 = vst [vmem:[%s2028_s10 + $0x30] sm:$0xff] %v976_v38  ;;  %1072 = vst [vmem:[%s2028_s10 + $0x130] sm:$0xff] %v1008_v40  ;;  %v806_v49 = vmul.f32 %v1986_v35, %v696_v53  ;;  %v620_v13 = vadd.f32 %v619_v19, %v1979_v34  ;;  %v700_v16 = vadd.f32 %v699_v50, %v1979_v34  ;;  %v625_v33 = vpop.f32.mrb[12].mxu0  ;;  %v705_v14 = vpop.f32.mrb[12].mxu1 }
 0x186   : > { %1041 = vst [vmem:[%s2028_s10 + $0x38] sm:$0xff] %v977_v9  ;;  %1073 = vst [vmem:[%s2028_s10 + $0x138] sm:$0xff] %v1009_v7  ;;  %v775_v46 = vmul.f32 %v1988_v60, %v618_v58  ;;  %v807_v47 = vmul.f32 %v1988_v60, %v698_v43  ;;  %v622_v39 = vadd.f32 %v621_v48, %v1984_v25  ;;  %v627_v32 = vpop.f32.mrb[13].mxu0  ;;  %v707_v36 = vpop.f32.mrb[13].mxu1 }
 0x187   : > { %v702_v41 = vadd.f32 %v701_v42, %v1984_v25  ;;  %v850_v17 = vadd.f32 %v1991_v61, %v774_v45  ;;  %v882_v8 = vadd.f32 %v1991_v61, %v806_v49  ;;  %v776_v30 = vmul.f32 %v1986_v35, %v620_v13  ;;  %v629_v37 = vpop.f32.mrb[14].mxu0  ;;  %v709_v21 = vpop.f32.mrb[14].mxu1 }
 0x188   : > { %v808_v59 = vmul.f32 %v1986_v35, %v700_v16  ;;  %v851_v19 = vadd.f32 %v1995_v31, %v775_v46  ;;  %v883_v50 = vadd.f32 %v1995_v31, %v807_v47  ;;  %v777_v6 = vmul.f32 %v1988_v60, %v622_v39  ;;  %v631_v23 = vpop.f32.mrb[15].mxu0  ;;  %v711_v22 = vpop.f32.mrb[15].mxu1 }
 0x189   : > { %v809_v52 = vmul.f32 %v1988_v60, %v702_v41  ;;  %v914_v48 = vadd.f32 %v850_v17, %v1798_v62  ;;  %v946_v42 = vadd.f32 %v882_v8, %v1804_v0  ;;  %v852_v24 = vadd.f32 %v1991_v61, %v776_v30 }
 0x18a   : > { %v884_v44 = vadd.f32 %v1991_v61, %v808_v59  ;;  %v915_v38 = vadd.f32 %v851_v19, %v1778_v54  ;;  %v947_v40 = vadd.f32 %v883_v50, %v1784_v56  ;;  %v853_v51 = vadd.f32 %v1995_v31, %v777_v6 }
 0x18b   : > { %v885_v53 = vadd.f32 %v1995_v31, %v809_v52  ;;  %v978_v62 = vmax.f32 %v914_v48, 0.0  ;;  %v1010_v0 = vmax.f32 %v946_v42, 0.0  ;;  %v916_v9 = vadd.f32 %v852_v24, %v1801_v63 }
 0x18c   : > { %v948_v7 = vadd.f32 %v884_v44, %v1807_v1  ;;  %v979_v58 = vmax.f32 %v915_v38, 0.0  ;;  %v1011_v43 = vmax.f32 %v947_v40, 0.0  ;;  %v917_v45 = vadd.f32 %v853_v51, %v1781_v55 }
 0x18d   : > { %v949_v54 = vadd.f32 %v885_v53, %v1787_v57  ;;  %1042 = vst [vmem:[%s2028_s10 + $0x40] sm:$0xff] %v978_v62  ;;  %1074 = vst [vmem:[%s2028_s10 + $0x140] sm:$0xff] %v1010_v0  ;;  %v980_v56 = vmax.f32 %v916_v9, 0.0  ;;  %v626_v13 = vadd.f32 %v625_v33, %v1979_v34  ;;  %v706_v16 = vadd.f32 %v705_v14, %v1979_v34  ;;  %v635_v57 = vpop.f32.mrb[16].mxu0  ;;  %v715_v47 = vpop.f32.mrb[16].mxu1 }
 0x18e   : > { %v1012_v49 = vmax.f32 %v948_v7, 0.0  ;;  %1043 = vst [vmem:[%s2028_s10 + $0x48] sm:$0xff] %v979_v58  ;;  %1075 = vst [vmem:[%s2028_s10 + $0x148] sm:$0xff] %v1011_v43  ;;  %v981_v63 = vmax.f32 %v917_v45, 0.0  ;;  %v628_v55 = vadd.f32 %v627_v32, %v1984_v25  ;;  %v708_v46 = vadd.f32 %v707_v36, %v1984_v25  ;;  %v637_v17 = vpop.f32.mrb[17].mxu0  ;;  %v717_v8 = vpop.f32.mrb[17].mxu1 }
 0x18f   : > { %v1013_v1 = vmax.f32 %v949_v54, 0.0  ;;  %1044 = vst [vmem:[%s2028_s10 + $0x50] sm:$0xff] %v980_v56  ;;  %v778_v39 = vmul.f32 %v1986_v35, %v626_v13  ;;  %v810_v41 = vmul.f32 %v1986_v35, %v706_v16  ;;  %v630_v33 = vadd.f32 %v629_v37, %v1979_v34  ;;  %v639_v19 = vpop.f32.mrb[18].mxu0  ;;  %v719_v50 = vpop.f32.mrb[18].mxu1 }
 0x190   : > { %1076 = vst [vmem:[%s2028_s10 + $0x150] sm:$0xff] %v1012_v49  ;;  %v710_v14 = vadd.f32 %v709_v21, %v1979_v34  ;;  %1045 = vst [vmem:[%s2028_s10 + $0x58] sm:$0xff] %v981_v63  ;;  %v779_v30 = vmul.f32 %v1988_v60, %v628_v55  ;;  %v811_v59 = vmul.f32 %v1988_v60, %v708_v46  ;;  %v641_v48 = vpop.f32.mrb[19].mxu0  ;;  %v721_v42 = vpop.f32.mrb[19].mxu1 }
 0x191   : > { %1077 = vst [vmem:[%s2028_s10 + $0x158] sm:$0xff] %v1013_v1  ;;  %v632_v32 = vadd.f32 %v631_v23, %v1984_v25  ;;  %v712_v36 = vadd.f32 %v711_v22, %v1984_v25  ;;  %v854_v6 = vadd.f32 %v1991_v61, %v778_v39  ;;  %v886_v52 = vadd.f32 %v1991_v61, %v810_v41 }
 0x192   : > { %v780_v37 = vmul.f32 %v1986_v35, %v630_v33  ;;  %v812_v21 = vmul.f32 %v1986_v35, %v710_v14  ;;  %v855_v24 = vadd.f32 %v1995_v31, %v779_v30  ;;  %v887_v44 = vadd.f32 %v1995_v31, %v811_v59 }
 0x193   : > { %v781_v23 = vmul.f32 %v1988_v60, %v632_v32  ;;  %v813_v22 = vmul.f32 %v1988_v60, %v712_v36  ;;  %v918_v38 = vadd.f32 %v854_v6, %v1830_v10  ;;  %v950_v40 = vadd.f32 %v886_v52, %v1836_v12 }
 0x194   : > { %v856_v51 = vadd.f32 %v1991_v61, %v780_v37  ;;  %v888_v53 = vadd.f32 %v1991_v61, %v812_v21  ;;  %v919_v62 = vadd.f32 %v855_v24, %v1810_v2  ;;  %v951_v0 = vadd.f32 %v887_v44, %v1816_v4 }
 0x195   : > { %v857_v9 = vadd.f32 %v1995_v31, %v781_v23  ;;  %v889_v7 = vadd.f32 %v1995_v31, %v813_v22  ;;  %v982_v58 = vmax.f32 %v918_v38, 0.0  ;;  %v1014_v43 = vmax.f32 %v950_v40, 0.0  ;;  %v2150_v49 = vpop.f32.mrb[20].mxu0  ;;  %v2152_v4 = vpop.f32.mrb[20].mxu1 }
 0x196   : > { %v920_v10 = vadd.f32 %v856_v51, %v1833_v11  ;;  %v952_v12 = vadd.f32 %v888_v53, %v1839_v15  ;;  %v983_v45 = vmax.f32 %v919_v62, 0.0  ;;  %v1015_v54 = vmax.f32 %v951_v0, 0.0  ;;  %v2158_v63 = vpop.f32.mrb[21].mxu0  ;;  %v2160_v1 = vpop.f32.mrb[21].mxu1 }
 0x197   : > { %v921_v56 = vadd.f32 %v857_v9, %v1813_v3  ;;  %v953_v2 = vadd.f32 %v889_v7, %v1819_v5  ;;  %1046 = vst [vmem:[%s2028_s10 + $0x60] sm:$0xff] %v982_v58  ;;  %1078 = vst [vmem:[%s2028_s10 + $0x160] sm:$0xff] %v1014_v43  ;;  %v636_v16 = vadd.f32 %v635_v57, %v1979_v34  ;;  %v2166_v39 = vpop.f32.mrb[22].mxu0  ;;  %v2168_v41 = vpop.f32.mrb[22].mxu1 }
 0x198   : > { %v984_v13 = vmax.f32 %v920_v10, 0.0  ;;  %v1016_v11 = vmax.f32 %v952_v12, 0.0  ;;  %v716_v15 = vadd.f32 %v715_v47, %v1979_v34  ;;  %1047 = vst [vmem:[%s2028_s10 + $0x68] sm:$0xff] %v983_v45  ;;  %1079 = vst [vmem:[%s2028_s10 + $0x168] sm:$0xff] %v1015_v54  ;;  %v638_v55 = vadd.f32 %v637_v17, %v1984_v25  ;;  %v651_v30 = vpop.f32.mrb[23].mxu0  ;;  %v731_v59 = vpop.f32.mrb[23].mxu1 }
 0x199   : > { %v985_v3 = vmax.f32 %v921_v56, 0.0  ;;  %v1017_v5 = vmax.f32 %v953_v2, 0.0  ;;  %v718_v46 = vadd.f32 %v717_v8, %v1984_v25  ;;  %v782_v57 = vmul.f32 %v1986_v35, %v636_v16  ;;  %v2507_v10 = vld [vmem:[#allocation11_spill] sm:$0xff]  ;;  %v2508_v45 = vld [vmem:[#allocation12_spill] sm:$0xff] }
 0x19a   : > { %1048 = vst [vmem:[%s2028_s10 + $0x70] sm:$0xff] %v984_v13  ;;  %1080 = vst [vmem:[%s2028_s10 + $0x170] sm:$0xff] %v1016_v11  ;;  %v814_v47 = vmul.f32 %v1986_v35, %v716_v15  ;;  %v640_v33 = vadd.f32 %v639_v19, %v1979_v34  ;;  %v720_v14 = vadd.f32 %v719_v50, %v1979_v34 }
 0x19b   : > { %1049 = vst [vmem:[%s2028_s10 + $0x78] sm:$0xff] %v985_v3  ;;  %1081 = vst [vmem:[%s2028_s10 + $0x178] sm:$0xff] %v1017_v5  ;;  %v783_v17 = vmul.f32 %v1988_v60, %v638_v55  ;;  %v815_v8 = vmul.f32 %v1988_v60, %v718_v46  ;;  %v642_v32 = vadd.f32 %v641_v48, %v1984_v25 }
 0x19c   : > { %v722_v36 = vadd.f32 %v721_v42, %v1984_v25  ;;  %v858_v6 = vadd.f32 %v1991_v61, %v782_v57  ;;  %v890_v52 = vadd.f32 %v1991_v61, %v814_v47  ;;  %v784_v19 = vmul.f32 %v1986_v35, %v640_v33 }
 0x19d   : > { %v816_v50 = vmul.f32 %v1986_v35, %v720_v14  ;;  %v859_v37 = vadd.f32 %v1995_v31, %v783_v17  ;;  %v891_v21 = vadd.f32 %v1995_v31, %v815_v8  ;;  %v785_v24 = vmul.f32 %v1988_v60, %v642_v32  ;;  %v2198_v62 = vpop.f32.mrb[24].mxu0  ;;  %v2200_v0 = vpop.f32.mrb[24].mxu1 }
 0x19e   : > { %v817_v44 = vmul.f32 %v1988_v60, %v722_v36  ;;  %v922_v48 = vadd.f32 %v858_v6, %v1862_v26  ;;  %v954_v42 = vadd.f32 %v890_v52, %v1868_v28  ;;  %v860_v23 = vadd.f32 %v1991_v61, %v784_v19  ;;  %v2204_v58 = vpop.f32.mrb[25].mxu0 }
 0x19f   : > { %v892_v22 = vadd.f32 %v1991_v61, %v816_v50  ;;  %v923_v38 = vadd.f32 %v859_v37, %v1842_v18  ;;  %v955_v40 = vadd.f32 %v891_v21, %v1848_v20  ;;  %v861_v51 = vadd.f32 %v1995_v31, %v785_v24  ;;  %v2206_v18 = vpop.f32.mrb[25].mxu1  ;;  %v2210_v56 = vpop.f32.mrb[26].mxu0  ;;  %v2510_v37 = vld [vmem:[#allocation19_spill] sm:$0xff] }
 0x1a0   : > { %v893_v53 = vadd.f32 %v1995_v31, %v817_v44  ;;  %v986_v26 = vmax.f32 %v922_v48, 0.0  ;;  %v1018_v28 = vmax.f32 %v954_v42, 0.0  ;;  %v924_v9 = vadd.f32 %v860_v23, %v1865_v27  ;;  %v2212_v2 = vpop.f32.mrb[26].mxu1  ;;  %v2220_v16 = vpop.f32.mrb[27].mxu0  ;;  %v2511_v23 = vld [vmem:[#allocation13_spill] sm:$0xff] }
 0x1a1   : > { %v956_v7 = vadd.f32 %v892_v22, %v1871_v29  ;;  %v987_v20 = vmax.f32 %v923_v38, 0.0  ;;  %v1019_v43 = vmax.f32 %v955_v40, 0.0  ;;  %v925_v12 = vadd.f32 %v861_v51, %v2507_v10  ;;  %v2222_v15 = vpop.f32.mrb[27].mxu1  ;;  %v2512_v38 = vld [vmem:[#allocation15_spill] sm:$0xff]  ;;  %v2514_v10 = vld [vmem:[#allocation20_spill] sm:$0xff] }
 0x1a2   : > { %v957_v54 = vadd.f32 %v893_v53, %v2508_v45  ;;  %1050 = vst [vmem:[%s2028_s10 + $0x80] sm:$0xff] %v986_v26  ;;  %1082 = vst [vmem:[%s2028_s10 + $0x180] sm:$0xff] %v1018_v28  ;;  %v988_v27 = vmax.f32 %v924_v9, 0.0  ;;  %v646_v13 = vadd.f32 %v2150_v49, %v1979_v34  ;;  %v726_v11 = vadd.f32 %v2152_v4, %v1979_v34 }
 0x1a3   : > { %v1020_v29 = vmax.f32 %v956_v7, 0.0  ;;  %1051 = vst [vmem:[%s2028_s10 + $0x88] sm:$0xff] %v987_v20  ;;  %1083 = vst [vmem:[%s2028_s10 + $0x188] sm:$0xff] %v1019_v43  ;;  %v989_v3 = vmax.f32 %v925_v12, 0.0  ;;  %v648_v55 = vadd.f32 %v2158_v63, %v1984_v25  ;;  %v728_v46 = vadd.f32 %v2160_v1, %v1984_v25  ;;  %v2513_v20 = vld [vmem:[#allocation18_spill] sm:$0xff] }
 0x1a4   : > { %v1021_v5 = vmax.f32 %v957_v54, 0.0  ;;  %1052 = vst [vmem:[%s2028_s10 + $0x90] sm:$0xff] %v988_v27  ;;  %v786_v49 = vmul.f32 %v1986_v35, %v646_v13  ;;  %v818_v4 = vmul.f32 %v1986_v35, %v726_v11  ;;  %v650_v57 = vadd.f32 %v2166_v39, %v1979_v34  ;;  %v2515_v13 = vld [vmem:[#allocation14_spill] sm:$0xff] }
 0x1a5   : > { %1084 = vst [vmem:[%s2028_s10 + $0x190] sm:$0xff] %v1020_v29  ;;  %v730_v47 = vadd.f32 %v2168_v41, %v1979_v34  ;;  %1053 = vst [vmem:[%s2028_s10 + $0x98] sm:$0xff] %v989_v3  ;;  %v787_v33 = vmul.f32 %v1988_v60, %v648_v55  ;;  %v819_v63 = vmul.f32 %v1988_v60, %v728_v46  ;;  %v2252_v19 = vpop.f32.mrb[28].mxu0  ;;  %v2516_v3 = vld [vmem:[#allocation16_spill] sm:$0xff] }
 0x1a6   : > { %1085 = vst [vmem:[%s2028_s10 + $0x198] sm:$0xff] %v1021_v5  ;;  %v652_v1 = vadd.f32 %v651_v30, %v1984_v25  ;;  %v732_v14 = vadd.f32 %v731_v59, %v1984_v25  ;;  %v862_v17 = vadd.f32 %v1991_v61, %v786_v49  ;;  %v894_v8 = vadd.f32 %v1991_v61, %v818_v4  ;;  %v2254_v30 = vpop.f32.mrb[28].mxu1  ;;  %v2509_v59 = vld [vmem:[#allocation17_spill] sm:$0xff]  ;;  %v2260_v48 = vpop.f32.mrb[29].mxu0 }
 0x1a7   : > { %v788_v32 = vmul.f32 %v1986_v35, %v650_v57  ;;  %v820_v39 = vmul.f32 %v1986_v35, %v730_v47  ;;  %v863_v41 = vadd.f32 %v1995_v31, %v787_v33  ;;  %v895_v36 = vadd.f32 %v1995_v31, %v819_v63  ;;  %v2262_v42 = vpop.f32.mrb[29].mxu1  ;;  %v2268_v26 = vpop.f32.mrb[30].mxu0 }
 0x1a8   : > { %v789_v6 = vmul.f32 %v1988_v60, %v652_v1  ;;  %v821_v52 = vmul.f32 %v1988_v60, %v732_v14  ;;  %v926_v50 = vadd.f32 %v862_v17, %v2509_v59  ;;  %v958_v21 = vadd.f32 %v894_v8, %v2510_v37  ;;  %v2270_v28 = vpop.f32.mrb[30].mxu1  ;;  %v2274_v45 = vpop.f32.mrb[31].mxu0 }
 0x1a9   : > { %v864_v24 = vadd.f32 %v1991_v61, %v788_v32  ;;  %v896_v44 = vadd.f32 %v1991_v61, %v820_v39  ;;  %v927_v22 = vadd.f32 %v863_v41, %v2511_v23  ;;  %v959_v40 = vadd.f32 %v895_v36, %v2512_v38  ;;  %v2276_v54 = vpop.f32.mrb[31].mxu1  ;;  %v2520_v23 = vld [vmem:[#allocation23_spill] sm:$0xff] }
 0x1aa   : > { %v865_v51 = vadd.f32 %v1995_v31, %v789_v6  ;;  %v897_v53 = vadd.f32 %v1995_v31, %v821_v52  ;;  %v990_v9 = vmax.f32 %v926_v50, 0.0  ;;  %v1022_v7 = vmax.f32 %v958_v21, 0.0  ;;  %v2518_v50 = vld [vmem:[#allocation27_spill] sm:$0xff] }
 0x1ab   : > { %v928_v43 = vadd.f32 %v864_v24, %v2513_v20  ;;  %v960_v12 = vadd.f32 %v896_v44, %v2514_v10  ;;  %v991_v27 = vmax.f32 %v927_v22, 0.0  ;;  %v1023_v29 = vmax.f32 %v959_v40, 0.0  ;;  %v2519_v24 = vld [vmem:[#allocation21_spill] sm:$0xff]  ;;  %v2522_v20 = vld [vmem:[#allocation28_spill] sm:$0xff] }
 0x1ac   : > { %v929_v11 = vadd.f32 %v865_v51, %v2515_v13  ;;  %v961_v5 = vadd.f32 %v897_v53, %v2516_v3  ;;  %1054 = vst [vmem:[%s2028_s10 + $0xa0] sm:$0xff] %v990_v9  ;;  %1086 = vst [vmem:[%s2028_s10 + $0x1a0] sm:$0xff] %v1022_v7  ;;  %v656_v49 = vadd.f32 %v2198_v62, %v1979_v34  ;;  %v2521_v9 = vld [vmem:[#allocation26_spill] sm:$0xff]  ;;  %v2524_v13 = vld [vmem:[#allocation24_spill] sm:$0xff] }
 0x1ad   : > { %v992_v55 = vmax.f32 %v928_v43, 0.0  ;;  %v1024_v46 = vmax.f32 %v960_v12, 0.0  ;;  %v736_v4 = vadd.f32 %v2200_v0, %v1979_v34  ;;  %1055 = vst [vmem:[%s2028_s10 + $0xa8] sm:$0xff] %v991_v27  ;;  %1087 = vst [vmem:[%s2028_s10 + $0x1a8] sm:$0xff] %v1023_v29  ;;  %v658_v33 = vadd.f32 %v2204_v58, %v1984_v25  ;;  %v2523_v27 = vld [vmem:[#allocation22_spill] sm:$0xff] }
 0x1ae   : > { %v993_v57 = vmax.f32 %v929_v11, 0.0  ;;  %v1025_v47 = vmax.f32 %v961_v5, 0.0  ;;  %v738_v63 = vadd.f32 %v2206_v18, %v1984_v25  ;;  %v790_v1 = vmul.f32 %v1986_v35, %v656_v49 }
 0x1af   : > { %1056 = vst [vmem:[%s2028_s10 + $0xb0] sm:$0xff] %v992_v55  ;;  %1088 = vst [vmem:[%s2028_s10 + $0x1b0] sm:$0xff] %v1024_v46  ;;  %v822_v14 = vmul.f32 %v1986_v35, %v736_v4  ;;  %v660_v62 = vadd.f32 %v2210_v56, %v1979_v34  ;;  %v740_v0 = vadd.f32 %v2212_v2, %v1979_v34 }
 0x1b0   : > { %1057 = vst [vmem:[%s2028_s10 + $0xb8] sm:$0xff] %v993_v57  ;;  %1089 = vst [vmem:[%s2028_s10 + $0x1b8] sm:$0xff] %v1025_v47  ;;  %v791_v17 = vmul.f32 %v1988_v60, %v658_v33  ;;  %v823_v58 = vmul.f32 %v1988_v60, %v738_v63  ;;  %v662_v18 = vadd.f32 %v2220_v16, %v1984_v25  ;;  %v2517_v16 = vld [vmem:[#allocation25_spill] sm:$0xff] }
 0x1b1   : > { %v742_v8 = vadd.f32 %v2222_v15, %v1984_v25  ;;  %v866_v32 = vadd.f32 %v1991_v61, %v790_v1  ;;  %v898_v39 = vadd.f32 %v1991_v61, %v822_v14  ;;  %v792_v56 = vmul.f32 %v1986_v35, %v660_v62 }
 0x1b2   : > { %v824_v2 = vmul.f32 %v1986_v35, %v740_v0  ;;  %v867_v41 = vadd.f32 %v1995_v31, %v791_v17  ;;  %v899_v36 = vadd.f32 %v1995_v31, %v823_v58  ;;  %v793_v6 = vmul.f32 %v1988_v60, %v662_v18  ;;  %v2525_v18 = vld [vmem:[#allocation33_spill] sm:$0xff] }
 0x1b3   : > { %v825_v52 = vmul.f32 %v1988_v60, %v742_v8  ;;  %v930_v59 = vadd.f32 %v866_v32, %v2517_v16  ;;  %v962_v15 = vadd.f32 %v898_v39, %v2518_v50  ;;  %v868_v37 = vadd.f32 %v1991_v61, %v792_v56  ;;  %v2527_v56 = vld [vmem:[#allocation29_spill] sm:$0xff]  ;;  %v2529_v16 = vld [vmem:[#allocation34_spill] sm:$0xff]  ;;  %v2530_v50 = vld [vmem:[#allocation36_spill] sm:$0xff] }
 0x1b4   : > { %v900_v21 = vadd.f32 %v1991_v61, %v824_v2  ;;  %v931_v44 = vadd.f32 %v867_v41, %v2519_v24  ;;  %v963_v22 = vadd.f32 %v899_v36, %v2520_v23  ;;  %v869_v38 = vadd.f32 %v1995_v31, %v793_v6  ;;  %v2528_v2 = vld [vmem:[#allocation31_spill] sm:$0xff] }
 0x1b5   : > { %v901_v40 = vadd.f32 %v1995_v31, %v825_v52  ;;  %v994_v51 = vmax.f32 %v930_v59, 0.0  ;;  %v1026_v53 = vmax.f32 %v962_v15, 0.0  ;;  %v932_v7 = vadd.f32 %v868_v37, %v2521_v9 }
 0x1b6   : > { %v964_v43 = vadd.f32 %v900_v21, %v2522_v20  ;;  %v995_v10 = vmax.f32 %v931_v44, 0.0  ;;  %v1027_v12 = vmax.f32 %v963_v22, 0.0  ;;  %v933_v29 = vadd.f32 %v869_v38, %v2523_v27  ;;  %v2531_v21 = vld [vmem:[#allocation30_spill] sm:$0xff]  ;;  %v2532_v44 = vld [vmem:[#allocation32_spill] sm:$0xff] }
 0x1b7   : > { %v965_v11 = vadd.f32 %v901_v40, %v2524_v13  ;;  %1058 = vst [vmem:[%s2028_s10 + $0xc0] sm:$0xff] %v994_v51  ;;  %1090 = vst [vmem:[%s2028_s10 + $0x1c0] sm:$0xff] %v1026_v53  ;;  %v996_v3 = vmax.f32 %v932_v7, 0.0  ;;  %v666_v55 = vadd.f32 %v2252_v19, %v1979_v34  ;;  %v746_v46 = vadd.f32 %v2254_v30, %v1979_v34 }
 0x1b8   : > { %v1028_v5 = vmax.f32 %v964_v43, 0.0  ;;  %1059 = vst [vmem:[%s2028_s10 + $0xc8] sm:$0xff] %v995_v10  ;;  %1091 = vst [vmem:[%s2028_s10 + $0x1c8] sm:$0xff] %v1027_v12  ;;  %v997_v49 = vmax.f32 %v933_v29, 0.0  ;;  %v668_v57 = vadd.f32 %v2260_v48, %v1984_v25  ;;  %v748_v47 = vadd.f32 %v2262_v42, %v1984_v25 }
 0x1b9   : > { %v1029_v4 = vmax.f32 %v965_v11, 0.0  ;;  %1060 = vst [vmem:[%s2028_s10 + $0xd0] sm:$0xff] %v996_v3  ;;  %v794_v33 = vmul.f32 %v1986_v35, %v666_v55  ;;  %v826_v63 = vmul.f32 %v1986_v35, %v746_v46  ;;  %v670_v19 = vadd.f32 %v2268_v26, %v1979_v34 }
 0x1ba   : > { %1092 = vst [vmem:[%s2028_s10 + $0x1d0] sm:$0xff] %v1028_v5  ;;  %v750_v30 = vadd.f32 %v2270_v28, %v1979_v34  ;;  %1061 = vst [vmem:[%s2028_s10 + $0xd8] sm:$0xff] %v997_v49  ;;  %v795_v1 = vmul.f32 %v1988_v60, %v668_v57  ;;  %v827_v48 = vmul.f32 %v1988_v60, %v748_v47 }
 0x1bb   : > { %1093 = vst [vmem:[%s2028_s10 + $0x1d8] sm:$0xff] %v1029_v4  ;;  %v672_v42 = vadd.f32 %v2274_v45, %v1984_v25  ;;  %v752_v14 = vadd.f32 %v2276_v54, %v1984_v25  ;;  %v870_v62 = vadd.f32 %v1991_v61, %v794_v33  ;;  %v902_v26 = vadd.f32 %v1991_v61, %v826_v63  ;;  %v2526_v54 = vld [vmem:[#allocation35_spill] sm:$0xff] }
 0x1bc   : > { %v796_v34 = vmul.f32 %v1986_v35, %v670_v19  ;;  %v828_v28 = vmul.f32 %v1986_v35, %v750_v30  ;;  %v871_v0 = vadd.f32 %v1995_v31, %v795_v1  ;;  %v903_v17 = vadd.f32 %v1995_v31, %v827_v48 }
 0x1bd   : > { %v797_v58 = vmul.f32 %v1988_v60, %v672_v42  ;;  %v829_v45 = vmul.f32 %v1988_v60, %v752_v14  ;;  %v934_v25 = vadd.f32 %v870_v62, %v2525_v18  ;;  %v966_v8 = vadd.f32 %v902_v26, %v2526_v54 }
 0x1be   : > { %v872_v32 = vadd.f32 %v1991_v61, %v796_v34  ;;  %v904_v39 = vadd.f32 %v1991_v61, %v828_v28  ;;  %v935_v35 = vadd.f32 %v871_v0, %v2527_v56  ;;  %v967_v41 = vadd.f32 %v903_v17, %v2528_v2 }
 0x1bf   : > { %v873_v36 = vadd.f32 %v1995_v31, %v797_v58  ;;  %v905_v6 = vadd.f32 %v1995_v31, %v829_v45  ;;  %v998_v60 = vmax.f32 %v934_v25, 0.0  ;;  %v1030_v52 = vmax.f32 %v966_v8, 0.0 }
 0x1c0   : > { %v936_v59 = vadd.f32 %v872_v32, %v2529_v16  ;;  %v968_v61 = vadd.f32 %v904_v39, %v2530_v50  ;;  %v999_v15 = vmax.f32 %v935_v35, 0.0  ;;  %v1031_v37 = vmax.f32 %v967_v41, 0.0 }
 0x1c1   : > { %v937_v24 = vadd.f32 %v873_v36, %v2531_v21  ;;  %v969_v31 = vadd.f32 %v905_v6, %v2532_v44  ;;  %1062 = vst [vmem:[%s2028_s10 + $0xe0] sm:$0xff] %v998_v60  ;;  %1094 = vst [vmem:[%s2028_s10 + $0x1e0] sm:$0xff] %v1030_v52 }
 0x1c2   : > { %v1000_v23 = vmax.f32 %v936_v59, 0.0  ;;  %v1032_v22 = vmax.f32 %v968_v61, 0.0  ;;  %1063 = vst [vmem:[%s2028_s10 + $0xe8] sm:$0xff] %v999_v15  ;;  %1095 = vst [vmem:[%s2028_s10 + $0x1e8] sm:$0xff] %v1031_v37 }
 0x1c3   : > { %v1001_v38 = vmax.f32 %v937_v24, 0.0  ;;  %v1033_v40 = vmax.f32 %v969_v31, 0.0 }
 0x1c4   : > { %1064 = vst [vmem:[%s2028_s10 + $0xf0] sm:$0xff] %v1000_v23  ;;  %1096 = vst [vmem:[%s2028_s10 + $0x1f0] sm:$0xff] %v1032_v22 }
 0x1c5   : > { %1065 = vst [vmem:[%s2028_s10 + $0xf8] sm:$0xff] %v1001_v38  ;;  %1097 = vst [vmem:[%s2028_s10 + $0x1f8] sm:$0xff] %v1033_v40 }
 0x1c6   : > { %1464 = shalt.err (!%p1461_p7)
}
 0x1c7   : > { %s1465_s26 = scalar_lea.hbm %s2383_s16, 8192  ;;  %s1469_s7 = scalar_lea.hbm %s2440_s5, 16384 }
 0x1c8   : > { %p1466_p9 = scmp.ne.s32.totalorder %s2383_s16, %s1465_s26  ;;  %p1470_p5 = scmp.lt.u32.totalorder %s2383_s16, %s2440_s5 }
 0x1c9   : > { %p1471_p11 = scmp.lt.u32.totalorder %s1469_s7, %s1465_s26  ;;  %p1473_p4 = scmp.lt.u32.totalorder %s1465_s26, %s2383_s16 }
 0x1ca   : > { %p1467_p2 = pnand %p1466_p9, %p1653_p12 }
 0x1cb   : > { %p1472_p1 = por %p1471_p11, %p1470_p5 }
 0x1cc   : > { %p1468_p0 = pneg %p1467_p2 }
 0x1cd   : > { %p1474_p6 = por %p1473_p4, %p1472_p1 }
 0x1cf   : > { %p1475_p8 = pnand %p1474_p6, %p1468_p0 }
 0x1d1   : > { %1478 = shalt.err (!%p1475_p8)
}
 0x1d2   : > { %s1530_s29 = smov 256   ;;  %s1531_s22 = smov 16  }
 0x1d3   : > { %1288 = dma.vmem_to_hbm [thread:$0]  (%p1653_p12), %s2385_s13, 8192, %s2383_s16, %s1099_s17, %s1530_s29, %s1530_s29, %s1531_s22  }
 0x1d4 PF: > { %s1128_s28 = sand.u32 1, %s1509_s18   ;;  %p2533_p10 = scmp.ne.s32.totalorder %s2471_s25, 0 }
 0x1d5   : > { %p2534_p13 = scmp.ge.s32.totalorder %s1521_s21, 2  ;;  %s1129_s27 = scalar_lea.sflag [#allocation4], %s1128_s28 }
 0x1d7   : > { %p1299_p3 = pnand %p2534_p13, %p2533_p10 }
 0x1d9   : > { %1504 = dma.done.wait (!%p1299_p3), %s1129_s27, 8192  }
 0x1da   : > { %1506 = vsyncadd (!%p1299_p3), %s1129_s27, 4294959104  ;;  %p19_p7 = scmp.ge.s32.totalorder %s1618_s30, 4   ;;  %s2535_s18 = smov %s1513_s19 }
 0x1db   : > { %s2536_s19 = smov %s1517_s20  ;;  %s2537_s20 = smov %s1649_s8 }
 0x1dc   : > { %s2538_s21 = smov %s1618_s30  ;;  %21 = sbr.rel (!%p19_p7) target bundleno = 6 (0x6), region = 89 }
 0x1e3   :  { %1134 = vsyncpa [#allocation3], 1 }
 0x1e4   :  { %1136 = vsyncpa [#allocation3 + $0x1], 1 }
 0x1e5   :  { %1137 = vsyncpa [#allocation6], 1 }
 0x1e6   :  { %1138 = vsyncpa [#allocation4], 1 }
 0x1e7   :  { %1140 = vsyncpa [#allocation4 + $0x1], 1 }

</bundles_post_ra>
